<compile_context>
chip_gen: v7x
topology: tpu7x:2x2x1
jax: 0.10.0
libtpu: 0.0.40
codegen_flags: <defaults>
</compile_context>

<pallas_src>
import jax
import jax.numpy as jnp
from jax import lax
from jax.experimental import pallas as pl
from jax.experimental.pallas import tpu as pltpu

N_ATOM_FEATURES = 16  # synthetic choice for the module's N_ATOM_FEATURES constant


# ------------------------------------------------------------------ kernel
def policy_kernel(x_ref, adj_ref,
                  w1_ref, b1_ref,
                  wh_ref, bh_ref,
                  wo_ref, bo_ref,
                  out_ref):
    Bb, N, F = x_ref.shape
    H = w1_ref.shape[1]

    # self.layer: Linear(F -> H) over all Bb*N rows in one bf16 MXU pass, f32 accumulate.
    x = x_ref[...].reshape(Bb * N, F).astype(jnp.bfloat16)
    h = jnp.dot(x, w1_ref[...], preferred_element_type=jnp.float32) + b1_ref[...]
    h3 = h.reshape(Bb, N, H)

    adj = adj_ref[...]                       # stays bf16 ({0,1} entries are exact)

    if N <= 32:
        # Small N: Bb tiny (N,N)@(N,H) matmuls would waste the MXU and pay per-matmul
        # push/drain; do the aggregation as an unrolled rank-1-update loop on the VPU
        # (f32 accumulate; adj is exact, h stays f32 -> no extra rounding here).
        out = jnp.zeros((Bb, N, H), jnp.float32)
        for j in range(N):                   # N is static and small -> full unroll
            out = out + adj[:, :, j:j + 1].astype(jnp.float32) * h3[:, j:j + 1, :]
    else:
        # Large N: batched MXU matmul with bf16 operands, f32 accumulation.
        out = jnp.einsum('bij,bjh->bih', adj, h3.astype(jnp.bfloat16),
                         preferred_element_type=jnp.float32)

    # Fused heads [pred_start | pred_end]: one (H, 2H) hidden matmul + bias + ReLU.
    hid = jnp.maximum(
        jnp.dot(out.reshape(Bb * N, H).astype(jnp.bfloat16), wh_ref[...],
                preferred_element_type=jnp.float32) + bh_ref[...],
        0.0)

    # Packed block-diagonal output projection, emitted directly as (2, Bb*N):
    # logits[p, r] = sum_k wo[p, k] * hid[r, k]  (NT contraction -> no XLU transpose,
    # result is already lane-dense along Bb*N for the store).
    logits = lax.dot_general(wo_ref[...], hid.astype(jnp.bfloat16),
                             dimension_numbers=(((1,), (1,)), ((), ())),
                             preferred_element_type=jnp.float32)
    logits = logits + bo_ref[...]

    if len(out_ref.shape) == 3:              # (1, 2, Bb*N) per-tile fallback layout
        out_ref[0] = logits
    else:                                    # (2, Bb*N) lane-dense slab
        out_ref[...] = logits


# ------------------------------------------------------------------ wrapper
def _rup(v, m):
    return -(-v // m) * m


def _vmem_capacity_bytes():
    try:
        return int(pltpu.get_tpu_info().vmem_capacity_bytes)
    except Exception:
        return 64 << 20                      # conservative (v7x-sized) fallback


def _per_element_vmem_bytes(N, F, H):
    """Approximate VMEM bytes per batch element, incl. double buffers and layout padding."""
    x_blk = _rup(N, 8) * _rup(F, 128) * 4            # f32 x tile, (8,128)-padded
    adj_blk = _rup(N, 16) * _rup(N, 128) * 2         # bf16 adj tile, (16,128)-padded
    out_blk = 8 * N * 4                              # output rows (2 -> 8 sublanes), f32
    pipelined = 2 * (x_blk + adj_blk + out_blk)      # double-buffered streams
    inter = 32 * N * H + 2 * N * F + 16 * N          # h/out/hid f32 + bf16 copies + logits
    return pipelined + inter


def policy_logits(x, adj, params, *, batch_tile=None):
    """Returns (start_logits, end_logits), each (B, N).

    All matmuls run on the MXU with bf16 operands and f32 accumulation; adjacency {0,1}
    entries are exact in bf16.
    """
    B, N, F = x.shape
    H = params["w1"].shape[1]

    # ---- fuse / pack head weights (tiny, done once outside the kernel) ----
    wh = jnp.concatenate([params["ws1"], params["we1"]], axis=1)        # (H, 2H)
    bh = jnp.concatenate([params["bs1"], params["be1"]], axis=1)        # (1, 2H)
    wo = jnp.zeros((2, 2 * H), jnp.float32)
    wo = wo.at[0, :H].set(params["ws2"][:, 0])
    wo = wo.at[1, H:].set(params["we2"][:, 0])                          # block-diag (2, 2H)
    bo = jnp.concatenate([params["bs2"], params["be2"]], axis=1).T      # (2, 1)

    w1_bf = params["w1"].astype(jnp.bfloat16)
    wh_bf = wh.astype(jnp.bfloat16)
    wo_bf = wo.astype(jnp.bfloat16)
    adj_bf = adj.astype(jnp.bfloat16)        # exact for {0,1}; halves adj HBM traffic
    # TODO(synk): gate the bf16 adjacency cast if adj is ever weighted / degree-normalized.

    # ---- per-generation VMEM budget (v5e/v6e: 128 MiB physical, v7x: 64 MiB) ----
    vmem_cap = _vmem_capacity_bytes()
    vmem_limit = min(int(vmem_cap * 3 // 4), 96 << 20)   # ~96 MiB v5e/v6e, ~48 MiB v7x
    block_budget = int(vmem_limit * 0.6)                 # headroom for scratch / spills
    per_elem = _per_element_vmem_bytes(N, F, H)
    fixed = 1 << 20                                      # weights, biases, slack

    if batch_tile is None:
        max_bb = max(1, (block_budget - fixed) // per_elem)
    else:
        max_bb = int(batch_tile)
    if B >= 2:
        max_bb = min(max_bb, -(-B // 2))     # >= 2 tiles -> both v7x TensorCores get work
    max_bb = max(1, min(max_bb, B))

    # Prefer a divisor of B (avoids a jnp.pad HBM copy of adj); among divisors prefer
    # tiles whose flattened row count is 128-lane aligned (unmasked, lane-dense stores).
    divisors = [d for d in range(1, max_bb + 1) if B % d == 0]
    lane_divs = [d for d in divisors if (d * N) % 128 == 0]
    if lane_divs:
        Bb = max(lane_divs)
    elif divisors and 2 * max(divisors) >= max_bb:
        Bb = max(divisors)
    else:
        Bb = max_bb                          # fall back to padding the tail tile
    nb = -(-B // Bb)
    Bp = nb * Bb
    if Bp != B:
        x = jnp.pad(x, ((0, Bp - B), (0, 0), (0, 0)))
        adj_bf = jnp.pad(adj_bf, ((0, Bp - B), (0, 0), (0, 0)))

    def const(shape):
        return pl.BlockSpec(shape, lambda i: (0,) * len(shape))

    in_specs = [
        pl.BlockSpec((Bb, N, F), lambda i: (i, 0, 0)),   # x batch tile (f32)
        pl.BlockSpec((Bb, N, N), lambda i: (i, 0, 0)),   # adj batch tile (bf16)
        const((F, H)), const((1, H)),                    # self.layer
        const((H, 2 * H)), const((1, 2 * H)),            # fused hidden layer
        const((2, 2 * H)), const((2, 1)),                # packed output projection
    ]
    # Optional knob (sweep once per generation): if the adj DMA is exposed at production
    # N, deepen its stream with pipeline_mode=pl.Buffered(3) on the adj BlockSpec.

    lane_dense = (nb == 1) or ((Bb * N) % 128 == 0)
    if lane_dense:
        out_shape = jax.ShapeDtypeStruct((2, Bp * N), jnp.float32)
        out_specs = pl.BlockSpec((2, Bb * N), lambda i: (0, i))
    else:
        # tiny-shape fallback: block last-two dims equal full array dims -> always legal
        out_shape = jax.ShapeDtypeStruct((nb, 2, Bb * N), jnp.float32)
        out_specs = pl.BlockSpec((1, 2, Bb * N), lambda i: (i, 0, 0))

    out = pl.pallas_call(
        policy_kernel,
        out_shape=out_shape,
        grid=(nb,),
        in_specs=in_specs,
        out_specs=out_specs,
        compiler_params=pltpu.CompilerParams(
            dimension_semantics=("parallel",),           # batch tiles split across TCs
            vmem_limit_bytes=int(vmem_limit)),
    )(x, adj_bf, w1_bf, params["b1"], wh_bf, bh, wo_bf, bo)

    if lane_dense:
        logits = out.reshape(2, Bp, N)[:, :B]
    else:
        logits = out.reshape(nb, 2, Bb, N).transpose(1, 0, 2, 3).reshape(2, Bp, N)[:, :B]
    return logits[0], logits[1]


def policy_forward(x, adj, params, key):
    """Mirrors PolicyNetwork.forward: ([action_start, action_end], [prob_start, prob_end])."""
    start_logits, end_logits = policy_logits(x, adj, params)   # (B, N) each
    key_s, key_e = jax.random.split(key)
    N = end_logits.shape[-1]

    # sample(start)
    prob_start = jax.nn.softmax(start_logits, axis=-1)
    action_start = jax.random.categorical(key_s, start_logits, axis=-1)   # (B,)

    # exclude(end, action_start): end[i, action_start[i]] = -1e10
    mask = jax.nn.one_hot(action_start, N, dtype=jnp.bool_)
    end_excl = jnp.where(mask, jnp.float32(-1e10), end_logits)

    # sample(end)
    prob_end = jax.nn.softmax(end_excl, axis=-1)
    action_end = jax.random.categorical(key_e, end_excl, axis=-1)

    return ([action_start, action_end], [prob_start, prob_end])


def init_params(key, hidden_dim=32, n_features=N_ATOM_FEATURES):
    """Deterministic nn.Linear-style init; weights stored as (in, out)."""
    keys = jax.random.split(key, 10)

    def lin(kw, kb, fan_in, fan_out):
        bound = 1.0 / float(fan_in) ** 0.5
        w = jax.random.uniform(kw, (fan_in, fan_out), jnp.float32, -bound, bound)
        b = jax.random.uniform(kb, (1, fan_out), jnp.float32, -bound, bound)
        return w, b

    w1, b1 = lin(keys[0], keys[1], n_features, hidden_dim)
    ws1, bs1 = lin(keys[2], keys[3], hidden_dim, hidden_dim)
    ws2, bs2 = lin(keys[4], keys[5], hidden_dim, 1)
    we1, be1 = lin(keys[6], keys[7], hidden_dim, hidden_dim)
    we2, be2 = lin(keys[8], keys[9], hidden_dim, 1)
    return dict(w1=w1, b1=b1, ws1=ws1, bs1=bs1, ws2=ws2, bs2=bs2,
                we1=we1, be1=be1, we2=we2, be2=be2)


def _reference_logits(x, adj, p):
    h = x @ p["w1"] + p["b1"]
    out = adj @ h
    hs = jnp.maximum(out @ p["ws1"] + p["bs1"], 0.0)
    start = (hs @ p["ws2"] + p["bs2"])[..., 0]
    he = jnp.maximum(out @ p["we1"] + p["be1"], 0.0)
    end = (he @ p["we2"] + p["be2"])[..., 0]
    return start, end


def _random_graph(key_x, key_adj, B, N, F):
    x = jax.random.normal(key_x, (B, N, F), jnp.float32)
    a = (jax.random.uniform(key_adj, (B, N, N)) > 0.5).astype(jnp.float32)
    adj = jnp.clip(a + jnp.transpose(a, (0, 2, 1)) + jnp.eye(N)[None], 0.0, 1.0)
    return x, adj


if __name__ == "__main__":
    B, N, F, H = 2, 8, N_ATOM_FEATURES, 32

    root = jax.random.PRNGKey(0)
    k_param, k_x, k_adj, k_sample, k_x2, k_adj2 = jax.random.split(root, 6)

    params = init_params(k_param, hidden_dim=H, n_features=F)
    x, adj = _random_graph(k_x, k_adj, B, N, F)

    # small-N config: VPU aggregation path + per-tile output layout, full forward pass
    start_logits, end_logits = policy_logits(x, adj, params)
    actions, probs = policy_forward(x, adj, params, k_sample)
    jax.block_until_ready((start_logits, end_logits, actions, probs))

    # bf16 MXU operands with f32 accumulation -> small (~1e-3 level) differences vs the
    # pure-f32 reference; tolerance is sized for that.
    ref_start, ref_end = _reference_logits(x, adj, params)
    assert jnp.allclose(start_logits, ref_start, atol=2e-2, rtol=2e-2)
    assert jnp.allclose(end_logits, ref_end, atol=2e-2, rtol=2e-2)
    assert actions[0].shape == (B,) and actions[1].shape == (B,)
    assert probs[0].shape == (B, N) and probs[1].shape == (B, N)

    # larger-N config: exercises the MXU (bf16 einsum) aggregation path and the
    # lane-dense (2, B*N) output layout (Bb*N = 128).
    N2 = 128
    x2, adj2 = _random_graph(k_x2, k_adj2, B, N2, F)
    s2, e2 = policy_logits(x2, adj2, params)
    jax.block_until_ready((s2, e2))
    r2s, r2e = _reference_logits(x2, adj2, params)
    assert jnp.allclose(s2, r2s, atol=3e-2, rtol=3e-2)
    assert jnp.allclose(e2, r2e, atol=3e-2, rtol=3e-2)

    print("KERNEL_OK")
</pallas_src>

<mosaic_0001>
module attributes {stable_mosaic.version = 11 : i64} {
  func.func @policy_kernel(%arg0: i32, %arg1: memref<1x8x16xf32, #tpu.memory_space<vmem>>, %arg2: memref<1x8x8xbf16, #tpu.memory_space<vmem>>, %arg3: memref<16x32xbf16, #tpu.memory_space<vmem>>, %arg4: memref<1x32xf32, #tpu.memory_space<vmem>>, %arg5: memref<32x64xbf16, #tpu.memory_space<vmem>>, %arg6: memref<1x64xf32, #tpu.memory_space<vmem>>, %arg7: memref<2x64xbf16, #tpu.memory_space<vmem>>, %arg8: memref<2x1xf32, #tpu.memory_space<vmem>>, %arg9: memref<1x2x8xf32, #tpu.memory_space<vmem>>) attributes {dimension_semantics = [#tpu.dimension_semantics<parallel>], iteration_bounds = array<i64: 2>, scalar_prefetch = 0 : i64, scratch_operands = 0 : i64, tpu.core_type = #tpu.core_type<tc>, window_params = [{transform_indices = @transform_0, window_bounds = array<i64: 1, 8, 16>}, {transform_indices = @transform_1, window_bounds = array<i64: 1, 8, 8>}, {pipeline_mode = #tpu.pipeline_mode<synchronous>, transform_indices = @transform_2, window_bounds = array<i64: 16, 32>}, {pipeline_mode = #tpu.pipeline_mode<synchronous>, transform_indices = @transform_3, window_bounds = array<i64: 1, 32>}, {pipeline_mode = #tpu.pipeline_mode<synchronous>, transform_indices = @transform_4, window_bounds = array<i64: 32, 64>}, {pipeline_mode = #tpu.pipeline_mode<synchronous>, transform_indices = @transform_5, window_bounds = array<i64: 1, 64>}, {pipeline_mode = #tpu.pipeline_mode<synchronous>, transform_indices = @transform_6, window_bounds = array<i64: 2, 64>}, {pipeline_mode = #tpu.pipeline_mode<synchronous>, transform_indices = @transform_7, window_bounds = array<i64: 2, 1>}, {transform_indices = @transform_8, window_bounds = array<i64: 1, 2, 8>}]} {
    %c0 = arith.constant 0 : index
    %c0_0 = arith.constant 0 : index
    %c0_1 = arith.constant 0 : index
    %0 = vector.load %arg1[%c0, %c0_0, %c0_1] : memref<1x8x16xf32, #tpu.memory_space<vmem>>, vector<1x8x16xf32>
    %1 = vector.shape_cast %0 : vector<1x8x16xf32> to vector<8x16xf32>
    %2 = arith.truncf %1 : vector<8x16xf32> to vector<8x16xbf16>
    %c0_2 = arith.constant 0 : index
    %c0_3 = arith.constant 0 : index
    %3 = vector.load %arg3[%c0_2, %c0_3] : memref<16x32xbf16, #tpu.memory_space<vmem>>, vector<16x32xbf16>
    %cst = arith.constant dense<0.000000e+00> : vector<8x32xf32>
    %4 = tpu.matmul %2, %3, %cst {dimension_numbers = #tpu.dot_dimension_numbers<[1], [0], [0], [1], [0, 0, 1, 1], [], []>} : vector<8x16xbf16>, vector<16x32xbf16>, vector<8x32xf32> -> vector<8x32xf32>
    %c0_4 = arith.constant 0 : index
    %c0_5 = arith.constant 0 : index
    %5 = vector.load %arg4[%c0_4, %c0_5] : memref<1x32xf32, #tpu.memory_space<vmem>>, vector<1x32xf32>
    %6 = vector.broadcast %5 : vector<1x32xf32> to vector<8x32xf32>
    %7 = arith.addf %4, %6 : vector<8x32xf32>
    %8 = vector.shape_cast %7 : vector<8x32xf32> to vector<1x8x32xf32>
    %c0_6 = arith.constant 0 : index
    %c0_7 = arith.constant 0 : index
    %c0_8 = arith.constant 0 : index
    %9 = vector.load %arg2[%c0_6, %c0_7, %c0_8] : memref<1x8x8xbf16, #tpu.memory_space<vmem>>, vector<1x8x8xbf16>
    %cst_9 = arith.constant 0.000000e+00 : f32
    %10 = vector.broadcast %cst_9 : f32 to vector<1x8x32xf32>
    %11 = vector.extract_strided_slice %9 {offsets = [0, 0, 0], sizes = [1, 8, 1], strides = [1, 1, 1]} : vector<1x8x8xbf16> to vector<1x8x1xbf16>
    %12 = arith.extf %11 : vector<1x8x1xbf16> to vector<1x8x1xf32>
    %13 = vector.extract_strided_slice %8 {offsets = [0, 0, 0], sizes = [1, 1, 32], strides = [1, 1, 1]} : vector<1x8x32xf32> to vector<1x1x32xf32>
    %14 = vector.broadcast %12 : vector<1x8x1xf32> to vector<1x8x32xf32>
    %15 = vector.broadcast %13 : vector<1x1x32xf32> to vector<1x8x32xf32>
    %16 = arith.mulf %14, %15 : vector<1x8x32xf32>
    %17 = arith.addf %10, %16 : vector<1x8x32xf32>
    %18 = vector.extract_strided_slice %9 {offsets = [0, 0, 1], sizes = [1, 8, 1], strides = [1, 1, 1]} : vector<1x8x8xbf16> to vector<1x8x1xbf16>
    %19 = arith.extf %18 : vector<1x8x1xbf16> to vector<1x8x1xf32>
    %20 = vector.extract_strided_slice %8 {offsets = [0, 1, 0], sizes = [1, 1, 32], strides = [1, 1, 1]} : vector<1x8x32xf32> to vector<1x1x32xf32>
    %21 = vector.broadcast %19 : vector<1x8x1xf32> to vector<1x8x32xf32>
    %22 = vector.broadcast %20 : vector<1x1x32xf32> to vector<1x8x32xf32>
    %23 = arith.mulf %21, %22 : vector<1x8x32xf32>
    %24 = arith.addf %17, %23 : vector<1x8x32xf32>
    %25 = vector.extract_strided_slice %9 {offsets = [0, 0, 2], sizes = [1, 8, 1], strides = [1, 1, 1]} : vector<1x8x8xbf16> to vector<1x8x1xbf16>
    %26 = arith.extf %25 : vector<1x8x1xbf16> to vector<1x8x1xf32>
    %27 = vector.extract_strided_slice %8 {offsets = [0, 2, 0], sizes = [1, 1, 32], strides = [1, 1, 1]} : vector<1x8x32xf32> to vector<1x1x32xf32>
    %28 = vector.broadcast %26 : vector<1x8x1xf32> to vector<1x8x32xf32>
    %29 = vector.broadcast %27 : vector<1x1x32xf32> to vector<1x8x32xf32>
    %30 = arith.mulf %28, %29 : vector<1x8x32xf32>
    %31 = arith.addf %24, %30 : vector<1x8x32xf32>
    %32 = vector.extract_strided_slice %9 {offsets = [0, 0, 3], sizes = [1, 8, 1], strides = [1, 1, 1]} : vector<1x8x8xbf16> to vector<1x8x1xbf16>
    %33 = arith.extf %32 : vector<1x8x1xbf16> to vector<1x8x1xf32>
    %34 = vector.extract_strided_slice %8 {offsets = [0, 3, 0], sizes = [1, 1, 32], strides = [1, 1, 1]} : vector<1x8x32xf32> to vector<1x1x32xf32>
    %35 = vector.broadcast %33 : vector<1x8x1xf32> to vector<1x8x32xf32>
    %36 = vector.broadcast %34 : vector<1x1x32xf32> to vector<1x8x32xf32>
    %37 = arith.mulf %35, %36 : vector<1x8x32xf32>
    %38 = arith.addf %31, %37 : vector<1x8x32xf32>
    %39 = vector.extract_strided_slice %9 {offsets = [0, 0, 4], sizes = [1, 8, 1], strides = [1, 1, 1]} : vector<1x8x8xbf16> to vector<1x8x1xbf16>
    %40 = arith.extf %39 : vector<1x8x1xbf16> to vector<1x8x1xf32>
    %41 = vector.extract_strided_slice %8 {offsets = [0, 4, 0], sizes = [1, 1, 32], strides = [1, 1, 1]} : vector<1x8x32xf32> to vector<1x1x32xf32>
    %42 = vector.broadcast %40 : vector<1x8x1xf32> to vector<1x8x32xf32>
    %43 = vector.broadcast %41 : vector<1x1x32xf32> to vector<1x8x32xf32>
    %44 = arith.mulf %42, %43 : vector<1x8x32xf32>
    %45 = arith.addf %38, %44 : vector<1x8x32xf32>
    %46 = vector.extract_strided_slice %9 {offsets = [0, 0, 5], sizes = [1, 8, 1], strides = [1, 1, 1]} : vector<1x8x8xbf16> to vector<1x8x1xbf16>
    %47 = arith.extf %46 : vector<1x8x1xbf16> to vector<1x8x1xf32>
    %48 = vector.extract_strided_slice %8 {offsets = [0, 5, 0], sizes = [1, 1, 32], strides = [1, 1, 1]} : vector<1x8x32xf32> to vector<1x1x32xf32>
    %49 = vector.broadcast %47 : vector<1x8x1xf32> to vector<1x8x32xf32>
    %50 = vector.broadcast %48 : vector<1x1x32xf32> to vector<1x8x32xf32>
    %51 = arith.mulf %49, %50 : vector<1x8x32xf32>
    %52 = arith.addf %45, %51 : vector<1x8x32xf32>
    %53 = vector.extract_strided_slice %9 {offsets = [0, 0, 6], sizes = [1, 8, 1], strides = [1, 1, 1]} : vector<1x8x8xbf16> to vector<1x8x1xbf16>
    %54 = arith.extf %53 : vector<1x8x1xbf16> to vector<1x8x1xf32>
    %55 = vector.extract_strided_slice %8 {offsets = [0, 6, 0], sizes = [1, 1, 32], strides = [1, 1, 1]} : vector<1x8x32xf32> to vector<1x1x32xf32>
    %56 = vector.broadcast %54 : vector<1x8x1xf32> to vector<1x8x32xf32>
    %57 = vector.broadcast %55 : vector<1x1x32xf32> to vector<1x8x32xf32>
    %58 = arith.mulf %56, %57 : vector<1x8x32xf32>
    %59 = arith.addf %52, %58 : vector<1x8x32xf32>
    %60 = vector.extract_strided_slice %9 {offsets = [0, 0, 7], sizes = [1, 8, 1], strides = [1, 1, 1]} : vector<1x8x8xbf16> to vector<1x8x1xbf16>
    %61 = arith.extf %60 : vector<1x8x1xbf16> to vector<1x8x1xf32>
    %62 = vector.extract_strided_slice %8 {offsets = [0, 7, 0], sizes = [1, 1, 32], strides = [1, 1, 1]} : vector<1x8x32xf32> to vector<1x1x32xf32>
    %63 = vector.broadcast %61 : vector<1x8x1xf32> to vector<1x8x32xf32>
    %64 = vector.broadcast %62 : vector<1x1x32xf32> to vector<1x8x32xf32>
    %65 = arith.mulf %63, %64 : vector<1x8x32xf32>
    %66 = arith.addf %59, %65 : vector<1x8x32xf32>
    %67 = vector.shape_cast %66 : vector<1x8x32xf32> to vector<8x32xf32>
    %68 = arith.truncf %67 : vector<8x32xf32> to vector<8x32xbf16>
    %c0_10 = arith.constant 0 : index
    %c0_11 = arith.constant 0 : index
    %69 = vector.load %arg5[%c0_10, %c0_11] : memref<32x64xbf16, #tpu.memory_space<vmem>>, vector<32x64xbf16>
    %cst_12 = arith.constant dense<0.000000e+00> : vector<8x64xf32>
    %70 = tpu.matmul %68, %69, %cst_12 {dimension_numbers = #tpu.dot_dimension_numbers<[1], [0], [0], [1], [0, 0, 1, 1], [], []>} : vector<8x32xbf16>, vector<32x64xbf16>, vector<8x64xf32> -> vector<8x64xf32>
    %c0_13 = arith.constant 0 : index
    %c0_14 = arith.constant 0 : index
    %71 = vector.load %arg6[%c0_13, %c0_14] : memref<1x64xf32, #tpu.memory_space<vmem>>, vector<1x64xf32>
    %72 = vector.broadcast %71 : vector<1x64xf32> to vector<8x64xf32>
    %73 = arith.addf %70, %72 : vector<8x64xf32>
    %cst_15 = arith.constant 0.000000e+00 : f32
    %74 = vector.broadcast %cst_15 : f32 to vector<8x64xf32>
    %75 = arith.maximumf %73, %74 : vector<8x64xf32>
    %c0_16 = arith.constant 0 : index
    %c0_17 = arith.constant 0 : index
    %76 = vector.load %arg7[%c0_16, %c0_17] : memref<2x64xbf16, #tpu.memory_space<vmem>>, vector<2x64xbf16>
    %77 = arith.truncf %75 : vector<8x64xf32> to vector<8x64xbf16>
    %cst_18 = arith.constant dense<0.000000e+00> : vector<2x8xf32>
    %78 = tpu.matmul %76, %77, %cst_18 {dimension_numbers = #tpu.dot_dimension_numbers<[1], [1], [0], [0], [0, 0, 1, 0], [], []>} : vector<2x64xbf16>, vector<8x64xbf16>, vector<2x8xf32> -> vector<2x8xf32>
    %c0_19 = arith.constant 0 : index
    %c0_20 = arith.constant 0 : index
    %79 = vector.load %arg8[%c0_19, %c0_20] : memref<2x1xf32, #tpu.memory_space<vmem>>, vector<2x1xf32>
    %80 = vector.broadcast %79 : vector<2x1xf32> to vector<2x8xf32>
    %81 = arith.addf %78, %80 : vector<2x8xf32>
    %c0_21 = arith.constant 0 : index
    %c0_22 = arith.constant 0 : index
    %c0_23 = arith.constant 0 : index
    %82 = vector.load %arg9[%c0_21, %c0_22, %c0_23] : memref<1x2x8xf32, #tpu.memory_space<vmem>>, vector<1x2x8xf32>
    %83 = vector.shape_cast %82 : vector<1x2x8xf32> to vector<2x8xf32>
    %84 = vector.shape_cast %81 : vector<2x8xf32> to vector<1x2x8xf32>
    tpu.vector_store %arg9[%c0_21, %c0_22, %c0_23], %84 {strides = array<i32>} : memref<1x2x8xf32, #tpu.memory_space<vmem>>, vector<1x2x8xf32>,
    return
  }
  func.func @transform_0(%arg0: i32) -> (i32, i32, i32) {
    %c0_i32 = arith.constant 0 : i32
    %c0_i32_0 = arith.constant 0 : i32
    %c0_i32_1 = arith.constant 0 : i32
    return %arg0, %c0_i32, %c0_i32_0 : i32, i32, i32
  }
  func.func @transform_1(%arg0: i32) -> (i32, i32, i32) {
    %c0_i32 = arith.constant 0 : i32
    %c0_i32_0 = arith.constant 0 : i32
    %c0_i32_1 = arith.constant 0 : i32
    return %arg0, %c0_i32, %c0_i32_0 : i32, i32, i32
  }
  func.func @transform_2(%arg0: i32) -> (i32, i32) {
    %c0_i32 = arith.constant 0 : i32
    %c0_i32_0 = arith.constant 0 : i32
    %c0_i32_1 = arith.constant 0 : i32
    return %c0_i32, %c0_i32_0 : i32, i32
  }
  func.func @transform_3(%arg0: i32) -> (i32, i32) {
    %c0_i32 = arith.constant 0 : i32
    %c0_i32_0 = arith.constant 0 : i32
    %c0_i32_1 = arith.constant 0 : i32
    return %c0_i32, %c0_i32_0 : i32, i32
  }
  func.func @transform_4(%arg0: i32) -> (i32, i32) {
    %c0_i32 = arith.constant 0 : i32
    %c0_i32_0 = arith.constant 0 : i32
    %c0_i32_1 = arith.constant 0 : i32
    return %c0_i32, %c0_i32_0 : i32, i32
  }
  func.func @transform_5(%arg0: i32) -> (i32, i32) {
    %c0_i32 = arith.constant 0 : i32
    %c0_i32_0 = arith.constant 0 : i32
    %c0_i32_1 = arith.constant 0 : i32
    return %c0_i32, %c0_i32_0 : i32, i32
  }
  func.func @transform_6(%arg0: i32) -> (i32, i32) {
    %c0_i32 = arith.constant 0 : i32
    %c0_i32_0 = arith.constant 0 : i32
    %c0_i32_1 = arith.constant 0 : i32
    return %c0_i32, %c0_i32_0 : i32, i32
  }
  func.func @transform_7(%arg0: i32) -> (i32, i32) {
    %c0_i32 = arith.constant 0 : i32
    %c0_i32_0 = arith.constant 0 : i32
    %c0_i32_1 = arith.constant 0 : i32
    return %c0_i32, %c0_i32_0 : i32, i32
  }
  func.func @transform_8(%arg0: i32) -> (i32, i32, i32) {
    %c0_i32 = arith.constant 0 : i32
    %c0_i32_0 = arith.constant 0 : i32
    %c0_i32_1 = arith.constant 0 : i32
    return %arg0, %c0_i32, %c0_i32_0 : i32, i32, i32
  }
}

</mosaic_0001>

<bundles_post_ra>
// kernel: tpu_custom_call.1
= control target key start
LH: loop header
LB: loop body
LE: loop exit
PB: predicated region body
PF: predicated region fallthrough
CT: control target
= control target key end

     0   :  { %s1379_s0 = inlined_call_operand.hbm [shape: f32[2,8,16], index: 0, kind: input, shape index: {}]   ;;  %s1380_s1 = inlined_call_operand.hbm [shape: bf16[2,8,8], index: 1, kind: input, shape index: {}]   ;;  %s1381_s2 = inlined_call_operand.hbm [shape: bf16[16,32], index: 2, kind: input, shape index: {}]   ;;  %s1382_s3 = inlined_call_operand.vmem [shape: f32[1,32], index: 3, kind: input, shape index: {}]   ;;  %s1383_s4 = inlined_call_operand.vmem [shape: bf16[32,64], index: 4, kind: input, shape index: {}]   ;;  %s1384_s5 = inlined_call_operand.vmem [shape: f32[1,64], index: 5, kind: input, shape index: {}]   ;;  %s1385_s6 = inlined_call_operand.vmem [shape: bf16[2,64], index: 6, kind: input, shape index: {}]   ;;  %s1386_s7 = inlined_call_operand.vmem [shape: f32[2,1], index: 7, kind: input, shape index: {}]   ;;  %s1387_s8 = inlined_call_operand.hbm [shape: f32[2,2,8], index: 8, kind: output, shape index: {}]  }
   0x1   :  { %1393 = sst [smem:[#allocation15_spill]] %s1379_s0 }
   0x2   :  { %1394 = sst [smem:[#allocation16_spill]] %s1381_s2 }
   0x3   :  { %13 = vsyncpa [#allocation3], 0 }
   0x4   :  { %15 = vsyncpa [#allocation3 + $0x1], 0 }
   0x5   :  { %16 = vsyncpa [#allocation6], 0 }
   0x6   :  { %18 = vsyncpa [#allocation6 + $0x1], 0 }
   0x7   :  { %19 = vsyncpa [#allocation4], 0 }
   0x8   :  { %21 = vsyncpa [#allocation4 + $0x1], 0  ;;  %s1122_s27 = smov 0   ;;  %s1124_s28 = smov 0  }
   0x9   :  { %s1126_s29 = smov 0   ;;  %s1128_s30 = smov 0  }
   0xa LB: > { %1395 = sst [smem:[#allocation13_spill]] %s1055_s29  ;;  %s1143_s9 = sadd.s32 4294967295, %s1059_s30   ;;  %s1059_s30 = sphi %s1128_s30, %s1418_s30   ;;  %s1055_s29 = sphi %s1126_s29, %s1415_s29   ;;  %s1051_s28 = sphi %s1124_s28, %s1417_s28   ;;  %s1047_s27 = sphi %s1122_s27, %s1416_s27  }
   0xb   : > { %s759_s10 = sadd.s32 4294967294, %s1059_s30   ;;  %p47_p0 = scmp.ne.s32.totalorder %s1051_s28, %s1047_s27 }
   0xc   : > { %p1388_p1 = scmp.eq.s32.totalorder %s1143_s9, 0  ;;  %p229_p3 = scmp.eq.s32.totalorder %s759_s10, 1 }
   0xd   : > { %p760_p5 = scmp.ge.s32.totalorder %s1059_s30, 1  ;;  %p236_p7 = scmp.lt.s32.totalorder %s1059_s30, 3 }
   0xe   : > { %p1152_p4 = por %p1388_p1, %p47_p0  ;;  %p1157_p6 = por %p229_p3, %p47_p0 }
   0xf   : > { %p1162_p8 = pnand %p760_p5, %p236_p7  ;;  %s1061_s14 = smov [#allocation7]  }
  0x10   : > { %s1396_s11 = scalar_select %p1152_p4, 1, 0 }
  0x11   : > { %s1397_s12 = scalar_select %p1157_p6, 1, 0 }
  0x12   : > { %s1398_s13 = scalar_select %p1162_p8, 1, 0 }
  0x13   : > { %s248_s15 = sshll.u32 %s1061_s14, 4  ;;  %p821_p9 = pneg %p1162_p8  ;;  %s1166_s15 = int_to_ptr.vmem [resolvable:$true] %s248_s15 }
  0x14   : > { %s1178_s17 = sadd.s32 1, %s1059_s30   ;;  %s34_s18 = sadd.s32 1, %s1055_s29 }
  0x15   : > { %p1173_p11 = pnand %p821_p9, %p1388_p1  ;;  %s31_s19 = ssub.s32 %s1059_s30, %s1178_s17 }
  0x16   : > { %s1400_s2 = sld [smem:[#allocation16_spill]] }
  0x17   : > { %p899_p13 = pneg %p1173_p11 }
  0x1c   : > { %s897_s22 = scalar_lea.hbm %s1400_s2, 128 }
  0x1d   : > { %p898_p12 = scmp.ne.s32.totalorder %s1400_s2, %s897_s22  ;;  %p904_p5 = scmp.lt.u32.totalorder %s897_s22, %s1400_s2 }
  0x1f   : > { %p900_p0 = pnand %p899_p13, %p898_p12 }
  0x21   : > { %p901_p3 = pneg %p900_p0 }
  0x23   : > { %p906_p7 = pnand %p904_p5, %p901_p3 }
  0x25   : > { %909 = shalt.err (!%p906_p7)
}
  0x26   : > { %s910_s10 = scalar_lea.vmem %s1166_s15, 128  ;;  %p918_p2 = scmp.lt.s32.totalorder %s1166_s15, %s1166_s15 }
  0x27   : > { %p911_p9 = scmp.ne.s32.totalorder %s1166_s15, %s910_s10  ;;  %p919_p6 = scmp.lt.s32.totalorder %s910_s10, %s910_s10 }
  0x29   : > { %p913_p10 = pnand %p911_p9, %p899_p13  ;;  %p920_p4 = por %p919_p6, %p918_p2 }
  0x2b   : > { %p914_p1 = pneg %p913_p10 }
  0x2d   : > { %p921_p8 = pnand %p920_p4, %p914_p1 }
  0x2f   : > { %924 = shalt.err (!%p921_p8)
}
  0x30   : > { %s1062_s14 = smov 64   ;;  %s1063_s20 = smov 4  }
  0x31   : > { %824 = dma.hbm_to_vmem [thread:$0]  (!%p1173_p11), %s1400_s2, 128, %s1166_s15, [#allocation6], %s1062_s14, %s1062_s14, %s1063_s20  }
  0x32   : > { %p32_p1 = scmp.eq.s32.totalorder %s31_s19, 0  ;;  %p41_p2 = scmp.ne.s32.totalorder %s1055_s29, %s1051_s28 }
  0x33   : > { %p42_p4 = scmp.eq.s32.totalorder %s1059_s30, 0  ;;  %p837_p6 = scmp.lt.s32.totalorder %s1059_s30, 2 }
  0x34   : > { %s1209_s23 = scalar_select %p32_p1, %s1055_s29, %s34_s18  }
  0x35   : > { %p43_p8 = por %p42_p4, %p41_p2  ;;  %p1402_p10 = scmp.eq.s32.totalorder %s1143_s9, 1 }
  0x36   : > { %1401 = sst [smem:[#allocation14_spill]] %s1209_s23  ;;  %s1218_s25 = sand.u32 1, %s1055_s29  }
  0x37   : > { %p1213_p12 = por %p1402_p10, %p41_p2  ;;  %s764_s16 = sshll.u32 %s1059_s30, 7 }
  0x38   : > { %s763_s26 = sshll.u32 %s1218_s25, 3  ;;  %s1404_s0 = sld [smem:[#allocation15_spill]] }
  0x39   : > { %s1403_s24 = scalar_select %p1213_p12, 1, 0 }
  0x3a   : > { %s281_s18 = scalar_lea.vmem [#allocation2], %s763_s26  ;;  %p1227_p11 = pnand %p837_p6, %p43_p8 }
  0x3b   : > { %s288_s14 = sshll.u32 %s281_s18, 4  ;;  %s278_s22 = scalar_lea.sflag [#allocation3], %s1218_s25  ;;  %s1231_s14 = int_to_ptr.vmem [resolvable:$true] %s288_s14 }
  0x3c   : > { %p927_p0 = pneg %p1227_p11 }
  0x3e   : > { %s1225_s19 = scalar_lea.hbm %s1404_s0, %s764_s16  ;;  %s930_s15 = scalar_lea.hbm %s1404_s0, 256 }
  0x3f   : > { %s925_s2 = scalar_lea.hbm %s1225_s19, 128  ;;  %p931_p7 = scmp.lt.u32.totalorder %s1225_s19, %s1404_s0 }
  0x40   : > { %p926_p13 = scmp.ne.s32.totalorder %s1225_s19, %s925_s2  ;;  %p932_p9 = scmp.lt.u32.totalorder %s930_s15, %s925_s2 }
  0x41   : > { %p934_p2 = scmp.lt.u32.totalorder %s925_s2, %s1225_s19 }
  0x42   : > { %p928_p3 = pnand %p927_p0, %p926_p13  ;;  %p933_p1 = por %p932_p9, %p931_p7 }
  0x44   : > { %p929_p5 = pneg %p928_p3  ;;  %p935_p4 = por %p934_p2, %p933_p1 }
  0x46   : > { %p936_p6 = pnand %p935_p4, %p929_p5 }
  0x48   : > { %939 = shalt.err (!%p936_p6)
}
  0x49   : > { %s940_s21 = scalar_lea.vmem %s1231_s14, 128  ;;  %s1064_s16 = smov [#allocation2]  }
  0x4a   : > { %p941_p8 = scmp.ne.s32.totalorder %s1231_s14, %s940_s21  ;;  %s945_s26 = sshll.u32 %s1064_s16, 4  ;;  %s946_s26 = int_to_ptr.vmem [resolvable:$false] %s945_s26 }
  0x4b   : > { %s947_s10 = scalar_lea.vmem %s946_s26, 256  ;;  %p948_p3 = scmp.lt.s32.totalorder %s1231_s14, %s946_s26 }
  0x4c   : > { %p943_p10 = pnand %p941_p8, %p927_p0  ;;  %p949_p7 = scmp.lt.s32.totalorder %s947_s10, %s940_s21 }
  0x4e   : > { %p944_p13 = pneg %p943_p10  ;;  %p950_p9 = por %p949_p7, %p948_p3 }
  0x50   : > { %p951_p1 = pnand %p950_p9, %p944_p13 }
  0x52   : > { %954 = shalt.err (!%p951_p1)
}
  0x53   : > { %828 = dma.hbm_to_vmem [thread:$0]  (!%p1227_p11), %s1225_s19, 128, %s1231_s14, %s278_s22  }
  0x54   : > { %s765_s2 = sshll.u32 %s1218_s25, 2  ;;  %s766_s15 = sshll.u32 %s1059_s30, 6 }
  0x55   : > { %s1265_s0 = scalar_lea.hbm %s1380_s1, %s766_s15  ;;  %s299_s21 = scalar_lea.vmem [#allocation5], %s765_s2 }
  0x56   : > { %s306_s26 = sshll.u32 %s299_s21, 4  ;;  %s1406_s10 = sand.u32 1, %s1059_s30   ;;  %s307_s26 = int_to_ptr.vmem [resolvable:$true] %s306_s26 }
  0x57   : > { %s296_s23 = scalar_lea.sflag [#allocation6], %s1406_s10  ;;  %s955_s29 = scalar_lea.hbm %s1265_s0, 64 }
  0x58   : > { %p956_p5 = scmp.ne.s32.totalorder %s1265_s0, %s955_s29  ;;  %s960_s14 = scalar_lea.hbm %s1380_s1, 128 }
  0x59   : > { %p961_p6 = scmp.lt.u32.totalorder %s1265_s0, %s1380_s1  ;;  %p962_p8 = scmp.lt.u32.totalorder %s960_s14, %s955_s29 }
  0x5a   : > { %p958_p2 = pnand %p956_p5, %p927_p0  ;;  %p964_p13 = scmp.lt.u32.totalorder %s955_s29, %s1265_s0 }
  0x5b   : > { %p963_p10 = por %p962_p8, %p961_p6 }
  0x5c   : > { %p959_p4 = pneg %p958_p2 }
  0x5d   : > { %p965_p3 = por %p964_p13, %p963_p10 }
  0x5f   : > { %p966_p7 = pnand %p965_p3, %p959_p4 }
  0x61   : > { %969 = shalt.err (!%p966_p7)
}
  0x62   : > { %s970_s2 = scalar_lea.vmem %s307_s26, 64  ;;  %s1065_s18 = smov [#allocation5]  }
  0x63   : > { %p971_p9 = scmp.ne.s32.totalorder %s307_s26, %s970_s2  ;;  %s975_s16 = sshll.u32 %s1065_s18, 4  ;;  %s976_s16 = int_to_ptr.vmem [resolvable:$false] %s975_s16 }
  0x64   : > { %s977_s21 = scalar_lea.vmem %s976_s16, 128  ;;  %p978_p2 = scmp.lt.s32.totalorder %s307_s26, %s976_s16 }
  0x65   : > { %p973_p1 = pnand %p971_p9, %p927_p0  ;;  %p979_p12 = scmp.lt.s32.totalorder %s977_s21, %s970_s2 }
  0x67   : > { %p974_p5 = pneg %p973_p1  ;;  %p980_p6 = por %p979_p12, %p978_p2 }
  0x69   : > { %p981_p8 = pnand %p980_p6, %p974_p5 }
  0x6b   : > { %984 = shalt.err (!%p981_p8)
}
  0x6c   : > { %831 = dma.hbm_to_vmem [thread:$0]  (!%p1227_p11), %s1265_s0, 64, %s307_s26, %s296_s23  }
  0x6d   : > { %p1407_p4 = scmp.ne.s32.totalorder %s1398_s13, 0 }
  0x6e   : > { %s1291_s29 = sand.u32 (!%p1407_p4), 1, %s1051_s28   ;;  %p1408_p0 = scmp.ne.s32.totalorder (!%p1407_p4), %s1396_s11, 0 }
  0x6f   : > { %315 = sbr.rel (%p1407_p4) target bundleno = 820 (0x334), region = 52  ;;  %s768_s10 = sshll.u32 (!%p1407_p4), %s1291_s29, 3 }
  0x70   : > { %s318_s25 = scalar_lea.sflag (!%p1407_p4), [#allocation3], %s1291_s29  ;;  %s321_s19 = scalar_lea.vmem (!%p1407_p4), [#allocation2], %s768_s10 }
  0x76   : > { %1030 = dma.done.wait (%p1408_p0), %s318_s25, 128  }
  0x77   : > { %1032 = vsyncadd (%p1408_p0), %s318_s25, 4294967168  ;;  %s326_s0 = sand.u32 1, %s1143_s9   ;;  %s769_s13 = sshll.u32 %s1291_s29, 2 }
  0x78   : > { %s327_s23 = scalar_lea.sflag [#allocation6], %s326_s0  ;;  %s330_s20 = scalar_lea.vmem [#allocation5], %s769_s13 }
  0x79   : > { %1034 = dma.done.wait (%p1408_p0), %s327_s23, 64  }
  0x7a   : > { %1036 = vsyncadd (%p1408_p0), %s327_s23, 4294967232  ;;  %p1409_p12 = scmp.eq.s32.totalorder %s1143_s9, 0 }
  0x7c   : > { %1038 = dma.done.wait (%p1409_p12), [#allocation6], 128   ;;  %p1410_p11 = pmov %p1409_p12 }
  0x7d   : > { %v1066_v0 = vmov 0.0   ;;  %vm1067_vm0 = vmmov 0   ;;  %v1068_v1 = vmov 2   ;;  %v1069_v2 = vmov 0   ;;  %v894_v3 = vld [vmem:[#allocation7] sm:$0xff]   ;;  %v373_v4 = vld [vmem:[%s321_s19] sm:$0xff] }
  0x7e   : > { %1040 = vsyncadd (%p1410_p11), [#allocation6], 4294967168  ;;  %791 = vmatprep.subr.bf16.mxu0 %v1066_v0  ;;  %793 = vmatprep.mubr.msk.bf16.mxu0 %vm1067_vm0, %v1066_v0  ;;  %vm390_vm1 = vcmask 130048   ;;  %v434_v5 = vld [vmem:[%s330_s20] sm:$0xf]  ;;  %v374_v6 = vpack.c.bf16 %v373_v4, %v373_v4  ;;  %v1070_v8 = vmov 3   ;;  %v441_v17 = vlaneseq }
  0x7f   : > { %887 = vset.pattern.permute.xlu1 %v1068_v1  ;;  %885 = vset.pattern.permute.xlu0 %v1069_v2  ;;  %v435_v7 = vunpack.c.l.bf16 %v434_v5  ;;  %v1071_v9 = vmov 1   ;;  %v1072_v10 = vmov 4   ;;  %v1073_v11 = vmov 5   ;;  %v895_v14 = vld [vmem:[%s1383_s4] sm:$0xff]   ;;  %v896_v15 = vld [vmem:[%s1383_s4 + $0x8] sm:$0xff]   ;;  %s771_s0 = sshll.u32 %s1291_s29, 1 }
  0x80   : > { %797 = vmatprep.subr.bf16.mxu1 %v1066_v0  ;;  %801 = vmatprep.mubr.msk.bf16.mxu1 %vm1067_vm0, %v1066_v0  ;;  %v1074_v12 = vmov 6   ;;  %v1075_v13 = vmov 7   ;;  %v442_v18 = vshrl.u32 %v441_v17, 7  ;;  %v772_v21 = vld [vmem:[%s1382_s3] ss:$0 sm:$0xff]  ;;  %vm541_vm2 = vcmask 261120  }
  0x81   : > { %792 = vmatpush3.bf16.msra.mxu0 %v894_v3  ;;  %458 = vperm.xlu1 %887, %v435_v7   ;;  %v775_v1 = vld [vmem:[%s1384_s5] ss:$0 sm:$0xff]  ;;  %vm594_vm3 = vcmask 523264   ;;  %s781_s13 = sshll.u32 %s1143_s9, 5  ;;  %s371_s23 = scalar_lea.vmem [#allocation8], %s771_s0  ;;  %vm641_vm4 = vcmask 58368  }
  0x82   : > { %805 = vmatprep.subr.bf16.mxu0 %v1066_v0  ;;  %438 = vperm.xlu0 %885, %v435_v7   ;;  %v443_v22 = vsub.s32 0, %v442_v18  ;;  %v453_v23 = vsub.s32 1, %v442_v18  ;;  %v463_v24 = vsub.s32 2, %v442_v18  ;;  %v473_v28 = vsub.s32 3, %v442_v18  ;;  %s657_s20 = sshll.u32 %s371_s23, 4  ;;  %s1335_s14 = scalar_lea.hbm %s1387_s8, %s781_s13  ;;  %s1337_s20 = int_to_ptr.vmem [resolvable:$true] %s657_s20 }
  0x83   : > { %798 = vmatpush3.bf16.msra.mxu1 %v895_v14  ;;  %v483_v32 = vsub.s32 4, %v442_v18  ;;  %v493_v37 = vsub.s32 5, %v442_v18  ;;  %v503_v41 = vsub.s32 6, %v442_v18  ;;  %v513_v46 = vsub.s32 7, %v442_v18  ;;  %s644_s9 = scalar_lea.sflag [#allocation4], %s1291_s29  ;;  %s985_s22 = scalar_lea.vmem %s1337_s20, 32 }
  0x84   : > { %794 = vmatmul.mubr.msk.bf16.vlgmr.msra.gmra.mrb[0].mxu0 %vm390_vm1, %v374_v6  ;;  %799 = vmatprep.subr.bf16.mxu1 %v1066_v0  ;;  %p986_p10 = scmp.ne.s32.totalorder %s1337_s20, %s985_s22  ;;  %p1411_p13 = scmp.ne.s32.totalorder %s1403_s24, 0 }
  0x85   : > { %807 = vmatprep.mubr.msk.bf16.mxu0 %vm1067_vm0, %v1066_v0  ;;  %888 = vset.pattern.permute.xlu1 %v1070_v8  ;;  %v588_v0 = vld [vmem:[%s1386_s7] sm:$0x3]  ;;  %s1076_s15 = smov [#allocation8]  }
  0x86   : > { %886 = vset.pattern.permute.xlu0 %v1071_v9  ;;  %468 = vperm.xlu1 %888, %v435_v7   ;;  %p987_p3 = pnand %p986_p10, %p1411_p13  ;;  %s989_s2 = sshll.u32 %s1076_s15, 4  ;;  %s990_s2 = int_to_ptr.vmem [resolvable:$false] %s989_s2 }
  0x87   : > { %448 = vperm.xlu0 %886, %v435_v7   ;;  %800 = vmatpush3.bf16.msra.mxu1 %v896_v15  ;;  %s991_s18 = scalar_lea.vmem %s990_s2, 64  ;;  %p992_p9 = scmp.lt.s32.totalorder %s1337_s20, %s990_s2 }
  0x88   : > { %p988_p7 = pneg %p987_p3  ;;  %p993_p1 = scmp.lt.s32.totalorder %s991_s18, %s985_s22 }
  0x8a   : > { %889 = vset.pattern.permute.xlu1 %v1072_v10  ;;  %v586_v10 = vld [vmem:[%s1385_s6] sm:$0x1]  ;;  %p994_p5 = por %p993_p1, %p992_p9 }
  0x8b   : > { %890 = vset.pattern.permute.xlu0 %v1073_v11  ;;  %478 = vperm.xlu1 %889, %v435_v7  }
  0x8c   : > { %488 = vperm.xlu0 %890, %v435_v7   ;;  %p995_p2 = pnand %p994_p5, %p988_p7 }
  0x8f   : > { %891 = vset.pattern.permute.xlu1 %v1074_v12 }
  0x90   : > { %893 = vset.pattern.permute.xlu0 %v1069_v2  ;;  %498 = vperm.xlu1 %891, %v435_v7  }
  0x91   : > { %591 = vperm.xlu0 %893, %v588_v0  }
  0x94   : > { %892 = vset.pattern.permute.xlu1 %v1075_v13 }
  0x95   : > { %508 = vperm.xlu1 %892, %v435_v7  }
 0x100   : > { %v459_v16 = vpop.permute.xlu1 %458 }
 0x101   : > { %v439_v20 = vpop.permute.xlu0 %438 }
 0x105   : > { %v469_v19 = vpop.permute.xlu1 %468 }
 0x106   : > { %v449_v36 = vpop.permute.xlu0 %448 }
 0x10a   : > { %v479_v29 = vpop.permute.xlu1 %478 }
 0x10b   : > { %v489_v50 = vpop.permute.xlu0 %488 }
 0x10f   : > { %v499_v45 = vpop.permute.xlu1 %498 }
 0x110   : > { %v592_v11 = vpop.permute.xlu0 %591 }
 0x114   : > { %v509_v57 = vpop.permute.xlu1 %508 }
 0x157   : > { %v428_v25 = vpop.f32.mrb[0].mxu0 }
 0x158   : > { %v429_v26 = vadd.f32 %v772_v21, %v428_v25  ;;  %v795_v27 = vpop.f32.mrb[1].mxu0 }
 0x159   : > { %v431_v30 = vpop.f32.mrb[2].mxu0 }
 0x15a   : > { %v796_v31 = vpop.f32.mrb[3].mxu0  ;;  %v444_v33 = vrot.slane %v429_v26, %v443_v22  ;;  %v454_v34 = vrot.slane %v429_v26, %v453_v23  ;;  %v464_v35 = vrot.slane %v429_v26, %v463_v24  ;;  %v474_v40 = vrot.slane %v429_v26, %v473_v28 }
 0x15b   : > { %v484_v44 = vrot.slane %v429_v26, %v483_v32  ;;  %v494_v49 = vrot.slane %v429_v26, %v493_v37  ;;  %v504_v53 = vrot.slane %v429_v26, %v503_v41  ;;  %v514_v54 = vrot.slane %v429_v26, %v513_v46 }
 0x15c   : > { %v445_v38 = vmul.f32 %v444_v33, %v439_v20  ;;  %v455_v39 = vmul.f32 %v454_v34, %v449_v36  ;;  %v465_v43 = vmul.f32 %v464_v35, %v459_v16  ;;  %v475_v48 = vmul.f32 %v474_v40, %v469_v19 }
 0x15d   : > { %v485_v52 = vmul.f32 %v484_v44, %v479_v29  ;;  %v495_v56 = vmul.f32 %v494_v49, %v489_v50  ;;  %v505_v59 = vmul.f32 %v504_v53, %v499_v45  ;;  %v515_v60 = vmul.f32 %v514_v54, %v509_v57 }
 0x15e   : > { %v456_v42 = vadd.f32 %v455_v39, %v445_v38 }
 0x160   : > { %v466_v47 = vadd.f32 %v465_v43, %v456_v42 }
 0x162   : > { %v476_v51 = vadd.f32 %v475_v48, %v466_v47 }
 0x164   : > { %v486_v55 = vadd.f32 %v485_v52, %v476_v51 }
 0x166   : > { %v496_v58 = vadd.f32 %v495_v56, %v486_v55 }
 0x168   : > { %v506_v61 = vadd.f32 %v505_v59, %v496_v58 }
 0x16a   : > { %v516_v62 = vadd.f32 %v515_v60, %v506_v61 }
 0x16c   : > { %v517_v63 = vpack.c.bf16 %v516_v62, %v516_v62 }
 0x16e   : > { %802 = vmatmul.mubr.msk.bf16.vlgmr.msra.gmra.mrb[0].mxu1 %vm541_vm2, %v517_v63 }
 0x241   : > { %v579_v2 = vpop.f32.mrb[0].mxu1 }
 0x242   : > { %v580_v3 = vadd.f32 %v775_v1, %v579_v2  ;;  %v803_v4 = vpop.f32.mrb[1].mxu1 }
 0x243   : > { %v582_v5 = vpop.f32.mrb[2].mxu1 }
 0x244   : > { %v585_v6 = vmax.f32 %v580_v3, 0.0  ;;  %v804_v7 = vpop.f32.mrb[3].mxu1 }
 0x246   : > { %v587_v8 = vpack.c.bf16 %v585_v6, %v585_v6 }
 0x248   : > { %v599_v9 = vsel %vm594_vm3, %v587_v8, 0 }
 0x249   : > { %806 = vmatpush3.bf16.xpose.msra.mxu0 %v599_v9 }
 0x250   : > { %808 = vmatmul.mubr.msk.bf16.vlgmr.msra.gmra.mrb[4].mxu0 %vm594_vm3, %v586_v10 }
 0x323   : > { %v635_v12 = vpop.f32.mrb[4].mxu0 }
 0x324   : > { %v636_v13 = vadd.f32 %v635_v12, %v592_v11  ;;  %v809_v14 = vpop.f32.mrb[5].mxu0 }
 0x325   : > { %v638_v15 = vpop.f32.mrb[6].mxu0 }
 0x326   : > { %v810_v16 = vpop.f32.mrb[7].mxu0  ;;  %642 = vst.msk [vmem:[%s371_s23] sm:$0x3] %vm641_vm4, %v636_v13 }
 0x327   : > { %998 = shalt.err (!%p995_p2)
}
 0x328   : > { %s999_s29 = scalar_lea.hbm %s1335_s14, 32  ;;  %s1003_s10 = scalar_lea.hbm %s1387_s8, 64 }
 0x329   : > { %p1000_p6 = scmp.ne.s32.totalorder %s1335_s14, %s999_s29  ;;  %p1004_p0 = scmp.lt.u32.totalorder %s1335_s14, %s1387_s8 }
 0x32a   : > { %p1005_p12 = scmp.lt.u32.totalorder %s1003_s10, %s999_s29  ;;  %p1007_p10 = scmp.lt.u32.totalorder %s999_s29, %s1335_s14 }
 0x32b   : > { %p1001_p8 = pnand %p1000_p6, %p1411_p13 }
 0x32c   : > { %p1006_p11 = por %p1005_p12, %p1004_p0 }
 0x32d   : > { %p1002_p4 = pneg %p1001_p8 }
 0x32e   : > { %p1008_p3 = por %p1007_p10, %p1006_p11 }
 0x330   : > { %p1009_p7 = pnand %p1008_p3, %p1002_p4 }
 0x332   : > { %1012 = shalt.err (!%p1009_p7)
}
 0x333   : > { %819 = dma.vmem_to_hbm [thread:$0]  (%p1411_p13), %s1337_s20, 32, %s1335_s14, %s644_s9  }
 0x334 PF: > { %s669_s0 = sand.u32 1, %s1047_s27   ;;  %p1412_p9 = scmp.ne.s32.totalorder %s1397_s12, 0 }
 0x335   : > { %p1413_p1 = scmp.ge.s32.totalorder %s1059_s30, 2  ;;  %s670_s13 = scalar_lea.sflag [#allocation4], %s669_s0 }
 0x337   : > { %p833_p5 = pnand %p1413_p1, %p1412_p9 }
 0x339   : > { %1042 = dma.done.wait (!%p833_p5), %s670_s13, 32  }
 0x33a   : > { %1044 = vsyncadd (!%p833_p5), %s670_s13, 4294967264  ;;  %s1414_s23 = sld [smem:[#allocation13_spill]]  ;;  %s1415_s29 = sld [smem:[#allocation14_spill]] }
 0x33b   : > { %p24_p2 = scmp.ge.s32.totalorder %s1178_s17, 4   ;;  %s1416_s27 = smov %s1051_s28 }
 0x33c   : > { %s1418_s30 = smov %s1178_s17 }
 0x33d   :  { %26 = sbr.rel (!%p24_p2) target bundleno = 10 (0xa), region = 114 }
 0x340   : > { %s1417_s28 = smov %s1414_s23 }
 0x344   :  { %675 = vsyncpa [#allocation3], 1 }
 0x345   :  { %677 = vsyncpa [#allocation3 + $0x1], 1 }
 0x346   :  { %678 = vsyncpa [#allocation6], 1 }
 0x347   :  { %680 = vsyncpa [#allocation6 + $0x1], 1 }
 0x348   :  { %681 = vsyncpa [#allocation4], 1 }
 0x349   :  { %683 = vsyncpa [#allocation4 + $0x1], 1 }

</bundles_post_ra>
